<compile_context>
chip_gen: v5e
topology: v5e:2x2
jax: 0.10.0
libtpu: 0.0.40
codegen_flags: <defaults>
</compile_context>

<pallas_src>
import math

import jax
import jax.numpy as jnp
from jax.experimental import pallas as pl
from jax.experimental.pallas import tpu as pltpu

_LANE = 128          # TPU lane width: pad output feature dims to multiples of this
_SMALL_K = 16        # below this, use the VPU MAC path for the adjacency contraction
_MiB = 1024 * 1024


# ----------------------------------------------------------------------------
# In-kernel building blocks
# ----------------------------------------------------------------------------
def _adj_apply(adj, support):
    """out[b, i, :] = sum_j adj[b, i, j] * support[b, j, :]   (float32 result).

    adj:     (TB, K, K)
    support: (TB, K, F) float32
    """
    TB, K, _ = adj.shape
    if K <= _SMALL_K:
        # K-step broadcast multiply-add on the VPU: exact f32 adjacency math and
        # no near-empty K-wide tiles pushed through the 128/256-wide MXU.
        adj_f32 = adj.astype(jnp.float32)
        acc = adj_f32[:, :, 0:1] * support[:, 0:1, :]
        for j in range(1, K):
            acc = acc + adj_f32[:, :, j:j + 1] * support[:, j:j + 1, :]
        return acc
    # Large K: batched bf16 matmul on the MXU with f32 accumulation.
    cd = jnp.bfloat16
    return jnp.einsum("bij,bjf->bif", adj.astype(cd), support.astype(cd),
                      preferred_element_type=jnp.float32)


def _graph_conv_block(x2d, adj, w, b):
    """One GraphConvolution on a batch block.

    x2d: (TB*K, F_in)   batch folded into the MXU M dimension (any float dtype)
    adj: (TB, K, K)     float32
    w:   (F_in, F_pad)  compute dtype (bf16), columns zero-padded to 128 lanes
    b:   (1, F_pad)     float32
    returns (TB*K, F_pad) float32
    """
    TB, K, _ = adj.shape
    f_pad = w.shape[1]
    # Weight matmul: one large MXU dot (in-kernel bf16 cast, f32 accumulation).
    support = jnp.dot(x2d.astype(w.dtype), w,
                      preferred_element_type=jnp.float32)       # (TB*K, F_pad) f32
    # Split the batch back out.  K is a sublane multiple at these shapes and the
    # lane dim is unchanged, so this reshape is layout-preserving.
    support = support.reshape(TB, K, f_pad)
    out = _adj_apply(adj, support)                               # (TB, K, F_pad) f32
    return out.reshape(TB * K, f_pad) + b                        # bias-add in f32


def gc_kernel(x_ref, adj_ref, w_ref, b_ref, o_ref):
    """Single GraphConvolution layer (the spec module)."""
    out = _graph_conv_block(x_ref[...], adj_ref[...], w_ref[...], b_ref[...])
    o_ref[...] = out.astype(o_ref.dtype)


def gcn_kernel(x_ref, adj_ref, w1_ref, b1_ref, w2_ref, b2_ref, o_ref):
    """Two GraphConvolution layers with ReLU between (inference; dropout = id)."""
    adj = adj_ref[...]                                           # (TB, K, K) f32
    # Layer 1: relu(adj @ (x @ W1) + b1); bias/ReLU in f32.
    h = jnp.maximum(
        _graph_conv_block(x_ref[...], adj, w1_ref[...], b1_ref[...]), 0.0)
    # Cast the hidden activation to bf16 right after the ReLU (the next dot rounds
    # it anyway); halves the largest f32 intermediate in VMEM.
    h = h.astype(w2_ref.dtype)
    # Layer 2: adj @ (h @ W2) + b2.
    out = _graph_conv_block(h, adj, w2_ref[...], b2_ref[...])
    o_ref[...] = out.astype(o_ref.dtype)


# ----------------------------------------------------------------------------
# Wrapper helpers
# ----------------------------------------------------------------------------
def _round_up(n, m):
    return ((n + m - 1) // m) * m


def _pad_last(a, n):
    pad = n - a.shape[-1]
    if pad <= 0:
        return a
    return jnp.pad(a, [(0, 0)] * (a.ndim - 1) + [(0, pad)])


def _pad_dim0(a, n):
    pad = n - a.shape[0]
    if pad <= 0:
        return a
    return jnp.pad(a, [(0, pad)] + [(0, 0)] * (a.ndim - 1))


def _default_vmem_budgets():
    """Chip-derived (budget, limit): v5e/v6e have 128 MiB VMEM, v7x 64 MiB per TC."""
    try:
        cap = pltpu.get_tpu_info().vmem_capacity_bytes
    except Exception:
        cap = 64 * _MiB                              # conservative fallback
    if cap >= 96 * _MiB:                             # v5e / v6e (128 MiB parts)
        return 88 * _MiB, 104 * _MiB
    return 28 * _MiB, 40 * _MiB                      # v7x (64 MiB per TensorCore)


def _select_batch_block(B, K, per_batch_bytes, weight_bytes, vmem_budget_bytes,
                        min_grid_steps=4):
    """Largest TB (a divisor of B) that fits the VMEM budget while keeping at
    least min(B, min_grid_steps) grid steps (DMA/compute pipelining + megacore)."""
    avail = max(vmem_budget_bytes - weight_bytes, per_batch_bytes)
    cap = max(int(avail // max(per_batch_bytes, 1)), 1)
    cap = min(cap, max(2048 // max(K, 1), 1))            # bound the MXU M dimension
    cap = min(cap, max(B // min(B, min_grid_steps), 1))  # never collapse to grid=(1,)
    tb = 1
    for d in range(1, min(cap, B) + 1):
        if B % d == 0:
            tb = d
    return tb


def _invariant_specs(shape_and_maps, single_buffer):
    """BlockSpecs for grid-invariant operands (weights / biases).

    With single_buffer=True they request pipeline_mode=pl.Buffered(1): only one
    VMEM copy is kept since they are fetched once and never change across steps."""
    specs = []
    for shape, imap in shape_and_maps:
        if single_buffer:
            specs.append(pl.BlockSpec(shape, imap, pipeline_mode=pl.Buffered(1)))
        else:
            specs.append(pl.BlockSpec(shape, imap))
    return specs


def _call_with_weight_buffering(build, args):
    """Prefer single-buffered grid-invariant weights; fall back to the default
    double-buffered pipeline if this Pallas build rejects pl.Buffered(1)."""
    try:
        return build(True)(*args)
    except Exception:
        return build(False)(*args)


# ----------------------------------------------------------------------------
# Public wrappers
# ----------------------------------------------------------------------------
def graph_convolution(x, adj, w, b=None, *,
                      compute_dtype=jnp.bfloat16,
                      vmem_budget_bytes=None,
                      vmem_limit_bytes=None):
    """out = adj @ (x @ w) + b with x: (B, K, F_in), adj: (B, K, K)."""
    B, K, F_in = x.shape
    f_out = w.shape[1]
    f_pad = _round_up(f_out, _LANE)
    out_dtype = x.dtype
    cb = jnp.dtype(compute_dtype).itemsize
    ob = jnp.dtype(out_dtype).itemsize

    if vmem_budget_bytes is None or vmem_limit_bytes is None:
        budget, limit = _default_vmem_budgets()
        vmem_budget_bytes = vmem_budget_bytes or budget
        vmem_limit_bytes = vmem_limit_bytes or limit

    if b is None:
        b = jnp.zeros((f_out,), jnp.float32)

    per_batch = (2 * K * (F_in + K) * 4           # f32 x rows + adj block (double-buffered)
                 + 2 * K * f_pad * ob             # output block (double-buffered)
                 + 3 * K * f_pad * 4)             # f32 intermediates (support / acc)
    weight_bytes = 2 * F_in * f_pad * cb + 2 * f_pad * 4
    TB = _select_batch_block(B, K, per_batch, weight_bytes, vmem_budget_bytes)
    grid = (B // TB,)

    x2 = x.reshape(B * K, F_in)                           # no dtype cast here (done in-kernel)
    wc = _pad_last(w, f_pad).astype(compute_dtype)        # zero-padded to 128-lane multiple
    bc = _pad_last(b.reshape(1, f_out), f_pad).astype(jnp.float32)

    def build(single_buffer_weights):
        wb_specs = _invariant_specs(
            [((F_in, f_pad), lambda i: (0, 0)),
             ((1, f_pad), lambda i: (0, 0))],
            single_buffer_weights)
        return pl.pallas_call(
            gc_kernel,
            out_shape=jax.ShapeDtypeStruct((B * K, f_pad), out_dtype),
            grid_spec=pltpu.PrefetchScalarGridSpec(
                num_scalar_prefetch=0,
                grid=grid,
                in_specs=[
                    pl.BlockSpec((TB * K, F_in), lambda i: (i, 0)),
                    pl.BlockSpec((TB, K, K), lambda i: (i, 0, 0)),
                ] + wb_specs,
                # Lane-dense 2-D output slab: unmasked vector stores.
                out_specs=pl.BlockSpec((TB * K, f_pad), lambda i: (i, 0)),
            ),
            compiler_params=pltpu.CompilerParams(
                dimension_semantics=("parallel",),
                vmem_limit_bytes=vmem_limit_bytes,
            ),
        )

    out = _call_with_weight_buffering(build, (x2, adj, wc, bc))
    if f_pad != f_out:
        out = out[:, :f_out]
    return out.reshape(B, K, f_out)


def gcn_forward(x, adj, w1, b1, w2, b2, *,
                compute_dtype=jnp.bfloat16,
                vmem_budget_bytes=None,
                vmem_limit_bytes=None):
    """Fused: out = adj @ (relu(adj @ (x @ W1) + b1) @ W2) + b2 (inference)."""
    B, K, F_in = x.shape
    nhid = w1.shape[1]
    f_out = w2.shape[1]
    nhid_pad = _round_up(nhid, _LANE)
    f_pad = _round_up(f_out, _LANE)
    out_dtype = x.dtype
    cb = jnp.dtype(compute_dtype).itemsize
    ob = jnp.dtype(out_dtype).itemsize

    if vmem_budget_bytes is None or vmem_limit_bytes is None:
        budget, limit = _default_vmem_budgets()
        vmem_budget_bytes = vmem_budget_bytes or budget
        vmem_limit_bytes = vmem_limit_bytes or limit

    per_batch = (2 * K * (F_in + K) * 4                  # f32 x rows + adj block (double-buffered)
                 + 2 * K * f_pad * ob                    # output block (double-buffered)
                 + K * (3 * nhid_pad + 3 * f_pad) * 4)   # f32 intermediates (support1/h/support2)
    weight_bytes = (2 * (F_in * nhid_pad + nhid_pad * f_pad) * cb
                    + 2 * (nhid_pad + f_pad) * 4)
    TB = _select_batch_block(B, K, per_batch, weight_bytes, vmem_budget_bytes)
    grid = (B // TB,)

    x2 = x.reshape(B * K, F_in)                          # no dtype cast here (done in-kernel)
    w1c = _pad_last(w1, nhid_pad).astype(compute_dtype)
    b1c = _pad_last(b1.reshape(1, nhid), nhid_pad).astype(jnp.float32)
    w2c = _pad_last(_pad_dim0(w2, nhid_pad), f_pad).astype(compute_dtype)
    b2c = _pad_last(b2.reshape(1, f_out), f_pad).astype(jnp.float32)

    def build(single_buffer_weights):
        wb_specs = _invariant_specs(
            [((F_in, nhid_pad), lambda i: (0, 0)),
             ((1, nhid_pad), lambda i: (0, 0)),
             ((nhid_pad, f_pad), lambda i: (0, 0)),
             ((1, f_pad), lambda i: (0, 0))],
            single_buffer_weights)
        return pl.pallas_call(
            gcn_kernel,
            out_shape=jax.ShapeDtypeStruct((B * K, f_pad), out_dtype),
            grid_spec=pltpu.PrefetchScalarGridSpec(
                num_scalar_prefetch=0,
                grid=grid,
                in_specs=[
                    pl.BlockSpec((TB * K, F_in), lambda i: (i, 0)),
                    pl.BlockSpec((TB, K, K), lambda i: (i, 0, 0)),
                ] + wb_specs,
                out_specs=pl.BlockSpec((TB * K, f_pad), lambda i: (i, 0)),
            ),
            compiler_params=pltpu.CompilerParams(
                dimension_semantics=("parallel",),
                vmem_limit_bytes=vmem_limit_bytes,
            ),
        )

    out = _call_with_weight_buffering(build, (x2, adj, w1c, b1c, w2c, b2c))
    if f_pad != f_out:
        out = out[:, :f_out]
    return out.reshape(B, K, f_out)


# ----------------------------------------------------------------------------
# Init + references (mirror the kernel's rounding points)
# ----------------------------------------------------------------------------
def init_gc_params(key, in_features, out_features):
    # Matches GraphConvolution.reset_parameters: uniform(-stdv, stdv), stdv = 1/sqrt(out_features)
    stdv = 1.0 / math.sqrt(out_features)
    kw, kb = jax.random.split(key)
    w = jax.random.uniform(kw, (in_features, out_features),
                           minval=-stdv, maxval=stdv, dtype=jnp.float32)
    b = jax.random.uniform(kb, (out_features,),
                           minval=-stdv, maxval=stdv, dtype=jnp.float32)
    return w, b


def _reference_gc(x, adj, w, b, compute_dtype=jnp.bfloat16):
    B, K, F_in = x.shape
    s = jnp.dot(x.reshape(B * K, F_in).astype(compute_dtype),
                w.astype(compute_dtype),
                preferred_element_type=jnp.float32).reshape(B, K, -1)
    out = jnp.einsum("bij,bjf->bif", adj.astype(jnp.float32), s,
                     preferred_element_type=jnp.float32)
    return out + b.astype(jnp.float32)


def _reference_gcn(x, adj, w1, b1, w2, b2, compute_dtype=jnp.bfloat16):
    h = jnp.maximum(_reference_gc(x, adj, w1, b1, compute_dtype), 0.0)
    h = h.astype(compute_dtype)   # mirror the kernel's post-ReLU cast
    return _reference_gc(h, adj, w2, b2, compute_dtype)


# ----------------------------------------------------------------------------
# Demo / self-check
# ----------------------------------------------------------------------------
if __name__ == "__main__":
    # Small shapes: batch=2, K=8 nodes, in_feat=16, nhid=32, out_feat=16
    B, K, F_IN, NHID, F_OUT = 2, 8, 16, 32, 16

    key = jax.random.PRNGKey(0)
    kx, kadj, k1, k2 = jax.random.split(key, 4)

    x = jax.random.normal(kx, (B, K, F_IN), dtype=jnp.float32)
    adj = jax.random.uniform(kadj, (B, K, K), dtype=jnp.float32)

    w1, b1 = init_gc_params(k1, F_IN, NHID)
    w2, b2 = init_gc_params(k2, NHID, F_OUT)

    # Single GraphConvolution layer (the exact spec module).
    out_gc = jax.block_until_ready(graph_convolution(x, adj, w1, b1))
    ref_gc = _reference_gc(x, adj, w1, b1)
    assert out_gc.shape == (B, K, NHID)
    assert jnp.allclose(out_gc, ref_gc, atol=2e-2, rtol=2e-2), \
        float(jnp.max(jnp.abs(out_gc - ref_gc)))

    # Fused two-layer GCN forward (dropout is identity at inference).
    out_gcn = jax.block_until_ready(gcn_forward(x, adj, w1, b1, w2, b2))
    ref_gcn = _reference_gcn(x, adj, w1, b1, w2, b2)
    assert out_gcn.shape == (B, K, F_OUT)
    assert jnp.allclose(out_gcn, ref_gcn, atol=2e-2, rtol=2e-2), \
        float(jnp.max(jnp.abs(out_gcn - ref_gcn)))

    print("KERNEL_OK")
</pallas_src>

<mosaic_0001>
module attributes {stable_mosaic.version = 11 : i64} {
  func.func @gc_kernel(%arg0: i32, %arg1: memref<8x16xf32, #tpu.memory_space<vmem>>, %arg2: memref<1x8x8xf32, #tpu.memory_space<vmem>>, %arg3: memref<16x128xbf16, #tpu.memory_space<vmem>>, %arg4: memref<1x128xf32, #tpu.memory_space<vmem>>, %arg5: memref<8x128xf32, #tpu.memory_space<vmem>>) attributes {dimension_semantics = [#tpu.dimension_semantics<parallel>], iteration_bounds = array<i64: 2>, scalar_prefetch = 0 : i64, scratch_operands = 0 : i64, tpu.core_type = #tpu.core_type<tc>, window_params = [{transform_indices = @transform_0, window_bounds = array<i64: 8, 16>}, {transform_indices = @transform_1, window_bounds = array<i64: 1, 8, 8>}, {pipeline_mode = #tpu.pipeline_mode<synchronous>, transform_indices = @transform_2, window_bounds = array<i64: 16, 128>}, {pipeline_mode = #tpu.pipeline_mode<synchronous>, transform_indices = @transform_3, window_bounds = array<i64: 1, 128>}, {transform_indices = @transform_4, window_bounds = array<i64: 8, 128>}]} {
    %c0 = arith.constant 0 : index
    %c0_0 = arith.constant 0 : index
    %0 = vector.load %arg1[%c0, %c0_0] : memref<8x16xf32, #tpu.memory_space<vmem>>, vector<8x16xf32>
    %c0_1 = arith.constant 0 : index
    %c0_2 = arith.constant 0 : index
    %c0_3 = arith.constant 0 : index
    %1 = vector.load %arg2[%c0_1, %c0_2, %c0_3] : memref<1x8x8xf32, #tpu.memory_space<vmem>>, vector<1x8x8xf32>
    %c0_4 = arith.constant 0 : index
    %c0_5 = arith.constant 0 : index
    %2 = vector.load %arg3[%c0_4, %c0_5] : memref<16x128xbf16, #tpu.memory_space<vmem>>, vector<16x128xbf16>
    %c0_6 = arith.constant 0 : index
    %c0_7 = arith.constant 0 : index
    %3 = vector.load %arg4[%c0_6, %c0_7] : memref<1x128xf32, #tpu.memory_space<vmem>>, vector<1x128xf32>
    %4 = arith.truncf %0 : vector<8x16xf32> to vector<8x16xbf16>
    %cst = arith.constant dense<0.000000e+00> : vector<8x128xf32>
    %5 = tpu.matmul %4, %2, %cst {dimension_numbers = #tpu.dot_dimension_numbers<[1], [0], [0], [1], [0, 0, 1, 1], [], []>} : vector<8x16xbf16>, vector<16x128xbf16>, vector<8x128xf32> -> vector<8x128xf32>
    %6 = vector.shape_cast %5 : vector<8x128xf32> to vector<1x8x128xf32>
    %7 = vector.extract_strided_slice %1 {offsets = [0, 0, 0], sizes = [1, 8, 1], strides = [1, 1, 1]} : vector<1x8x8xf32> to vector<1x8x1xf32>
    %8 = vector.extract_strided_slice %6 {offsets = [0, 0, 0], sizes = [1, 1, 128], strides = [1, 1, 1]} : vector<1x8x128xf32> to vector<1x1x128xf32>
    %9 = vector.broadcast %7 : vector<1x8x1xf32> to vector<1x8x128xf32>
    %10 = vector.broadcast %8 : vector<1x1x128xf32> to vector<1x8x128xf32>
    %11 = arith.mulf %9, %10 : vector<1x8x128xf32>
    %12 = vector.extract_strided_slice %1 {offsets = [0, 0, 1], sizes = [1, 8, 1], strides = [1, 1, 1]} : vector<1x8x8xf32> to vector<1x8x1xf32>
    %13 = vector.extract_strided_slice %6 {offsets = [0, 1, 0], sizes = [1, 1, 128], strides = [1, 1, 1]} : vector<1x8x128xf32> to vector<1x1x128xf32>
    %14 = vector.broadcast %12 : vector<1x8x1xf32> to vector<1x8x128xf32>
    %15 = vector.broadcast %13 : vector<1x1x128xf32> to vector<1x8x128xf32>
    %16 = arith.mulf %14, %15 : vector<1x8x128xf32>
    %17 = arith.addf %11, %16 : vector<1x8x128xf32>
    %18 = vector.extract_strided_slice %1 {offsets = [0, 0, 2], sizes = [1, 8, 1], strides = [1, 1, 1]} : vector<1x8x8xf32> to vector<1x8x1xf32>
    %19 = vector.extract_strided_slice %6 {offsets = [0, 2, 0], sizes = [1, 1, 128], strides = [1, 1, 1]} : vector<1x8x128xf32> to vector<1x1x128xf32>
    %20 = vector.broadcast %18 : vector<1x8x1xf32> to vector<1x8x128xf32>
    %21 = vector.broadcast %19 : vector<1x1x128xf32> to vector<1x8x128xf32>
    %22 = arith.mulf %20, %21 : vector<1x8x128xf32>
    %23 = arith.addf %17, %22 : vector<1x8x128xf32>
    %24 = vector.extract_strided_slice %1 {offsets = [0, 0, 3], sizes = [1, 8, 1], strides = [1, 1, 1]} : vector<1x8x8xf32> to vector<1x8x1xf32>
    %25 = vector.extract_strided_slice %6 {offsets = [0, 3, 0], sizes = [1, 1, 128], strides = [1, 1, 1]} : vector<1x8x128xf32> to vector<1x1x128xf32>
    %26 = vector.broadcast %24 : vector<1x8x1xf32> to vector<1x8x128xf32>
    %27 = vector.broadcast %25 : vector<1x1x128xf32> to vector<1x8x128xf32>
    %28 = arith.mulf %26, %27 : vector<1x8x128xf32>
    %29 = arith.addf %23, %28 : vector<1x8x128xf32>
    %30 = vector.extract_strided_slice %1 {offsets = [0, 0, 4], sizes = [1, 8, 1], strides = [1, 1, 1]} : vector<1x8x8xf32> to vector<1x8x1xf32>
    %31 = vector.extract_strided_slice %6 {offsets = [0, 4, 0], sizes = [1, 1, 128], strides = [1, 1, 1]} : vector<1x8x128xf32> to vector<1x1x128xf32>
    %32 = vector.broadcast %30 : vector<1x8x1xf32> to vector<1x8x128xf32>
    %33 = vector.broadcast %31 : vector<1x1x128xf32> to vector<1x8x128xf32>
    %34 = arith.mulf %32, %33 : vector<1x8x128xf32>
    %35 = arith.addf %29, %34 : vector<1x8x128xf32>
    %36 = vector.extract_strided_slice %1 {offsets = [0, 0, 5], sizes = [1, 8, 1], strides = [1, 1, 1]} : vector<1x8x8xf32> to vector<1x8x1xf32>
    %37 = vector.extract_strided_slice %6 {offsets = [0, 5, 0], sizes = [1, 1, 128], strides = [1, 1, 1]} : vector<1x8x128xf32> to vector<1x1x128xf32>
    %38 = vector.broadcast %36 : vector<1x8x1xf32> to vector<1x8x128xf32>
    %39 = vector.broadcast %37 : vector<1x1x128xf32> to vector<1x8x128xf32>
    %40 = arith.mulf %38, %39 : vector<1x8x128xf32>
    %41 = arith.addf %35, %40 : vector<1x8x128xf32>
    %42 = vector.extract_strided_slice %1 {offsets = [0, 0, 6], sizes = [1, 8, 1], strides = [1, 1, 1]} : vector<1x8x8xf32> to vector<1x8x1xf32>
    %43 = vector.extract_strided_slice %6 {offsets = [0, 6, 0], sizes = [1, 1, 128], strides = [1, 1, 1]} : vector<1x8x128xf32> to vector<1x1x128xf32>
    %44 = vector.broadcast %42 : vector<1x8x1xf32> to vector<1x8x128xf32>
    %45 = vector.broadcast %43 : vector<1x1x128xf32> to vector<1x8x128xf32>
    %46 = arith.mulf %44, %45 : vector<1x8x128xf32>
    %47 = arith.addf %41, %46 : vector<1x8x128xf32>
    %48 = vector.extract_strided_slice %1 {offsets = [0, 0, 7], sizes = [1, 8, 1], strides = [1, 1, 1]} : vector<1x8x8xf32> to vector<1x8x1xf32>
    %49 = vector.extract_strided_slice %6 {offsets = [0, 7, 0], sizes = [1, 1, 128], strides = [1, 1, 1]} : vector<1x8x128xf32> to vector<1x1x128xf32>
    %50 = vector.broadcast %48 : vector<1x8x1xf32> to vector<1x8x128xf32>
    %51 = vector.broadcast %49 : vector<1x1x128xf32> to vector<1x8x128xf32>
    %52 = arith.mulf %50, %51 : vector<1x8x128xf32>
    %53 = arith.addf %47, %52 : vector<1x8x128xf32>
    %54 = vector.shape_cast %53 : vector<1x8x128xf32> to vector<8x128xf32>
    %55 = vector.broadcast %3 : vector<1x128xf32> to vector<8x128xf32>
    %56 = arith.addf %54, %55 : vector<8x128xf32>
    %c0_8 = arith.constant 0 : index
    %c0_9 = arith.constant 0 : index
    %57 = vector.load %arg5[%c0_8, %c0_9] : memref<8x128xf32, #tpu.memory_space<vmem>>, vector<8x128xf32>
    tpu.vector_store %arg5[%c0_8, %c0_9], %56 {strides = array<i32>} : memref<8x128xf32, #tpu.memory_space<vmem>>, vector<8x128xf32>,
    return
  }
  func.func @transform_0(%arg0: i32) -> (i32, i32) {
    %c0_i32 = arith.constant 0 : i32
    %c0_i32_0 = arith.constant 0 : i32
    return %arg0, %c0_i32 : i32, i32
  }
  func.func @transform_1(%arg0: i32) -> (i32, i32, i32) {
    %c0_i32 = arith.constant 0 : i32
    %c0_i32_0 = arith.constant 0 : i32
    %c0_i32_1 = arith.constant 0 : i32
    return %arg0, %c0_i32, %c0_i32_0 : i32, i32, i32
  }
  func.func @transform_2(%arg0: i32) -> (i32, i32) {
    %c0_i32 = arith.constant 0 : i32
    %c0_i32_0 = arith.constant 0 : i32
    %c0_i32_1 = arith.constant 0 : i32
    return %c0_i32, %c0_i32_0 : i32, i32
  }
  func.func @transform_3(%arg0: i32) -> (i32, i32) {
    %c0_i32 = arith.constant 0 : i32
    %c0_i32_0 = arith.constant 0 : i32
    %c0_i32_1 = arith.constant 0 : i32
    return %c0_i32, %c0_i32_0 : i32, i32
  }
  func.func @transform_4(%arg0: i32) -> (i32, i32) {
    %c0_i32 = arith.constant 0 : i32
    %c0_i32_0 = arith.constant 0 : i32
    return %arg0, %c0_i32 : i32, i32
  }
}

module attributes {stable_mosaic.version = 11 : i64} {
  func.func @gc_kernel(%arg0: i32, %arg1: memref<8x16xf32, #tpu.memory_space<vmem>>, %arg2: memref<1x8x8xf32, #tpu.memory_space<vmem>>, %arg3: memref<16x128xbf16, #tpu.memory_space<vmem>>, %arg4: memref<1x128xf32, #tpu.memory_space<vmem>>, %arg5: memref<8x128xf32, #tpu.memory_space<vmem>>) attributes {dimension_semantics = [#tpu.dimension_semantics<parallel>], iteration_bounds = array<i64: 2>, scalar_prefetch = 0 : i64, scratch_operands = 0 : i64, tpu.core_type = #tpu.core_type<tc>, window_params = [{transform_indices = @transform_0, window_bounds = array<i64: 8, 16>}, {transform_indices = @transform_1, window_bounds = array<i64: 1, 8, 8>}, {pipeline_mode = #tpu.pipeline_mode<synchronous>, transform_indices = @transform_2, window_bounds = array<i64: 16, 128>}, {pipeline_mode = #tpu.pipeline_mode<synchronous>, transform_indices = @transform_3, window_bounds = array<i64: 1, 128>}, {transform_indices = @transform_4, window_bounds = array<i64: 8, 128>}]} {
    %c0 = arith.constant 0 : index
    %c0_0 = arith.constant 0 : index
    %0 = vector.load %arg1[%c0, %c0_0] : memref<8x16xf32, #tpu.memory_space<vmem>>, vector<8x16xf32>
    %c0_1 = arith.constant 0 : index
    %c0_2 = arith.constant 0 : index
    %c0_3 = arith.constant 0 : index
    %1 = vector.load %arg2[%c0_1, %c0_2, %c0_3] : memref<1x8x8xf32, #tpu.memory_space<vmem>>, vector<1x8x8xf32>
    %c0_4 = arith.constant 0 : index
    %c0_5 = arith.constant 0 : index
    %2 = vector.load %arg3[%c0_4, %c0_5] : memref<16x128xbf16, #tpu.memory_space<vmem>>, vector<16x128xbf16>
    %c0_6 = arith.constant 0 : index
    %c0_7 = arith.constant 0 : index
    %3 = vector.load %arg4[%c0_6, %c0_7] : memref<1x128xf32, #tpu.memory_space<vmem>>, vector<1x128xf32>
    %4 = arith.truncf %0 : vector<8x16xf32> to vector<8x16xbf16>
    %cst = arith.constant dense<0.000000e+00> : vector<8x128xf32>
    %5 = tpu.matmul %4, %2, %cst {dimension_numbers = #tpu.dot_dimension_numbers<[1], [0], [0], [1], [0, 0, 1, 1], [], []>} : vector<8x16xbf16>, vector<16x128xbf16>, vector<8x128xf32> -> vector<8x128xf32>
    %6 = vector.shape_cast %5 : vector<8x128xf32> to vector<1x8x128xf32>
    %7 = vector.extract_strided_slice %1 {offsets = [0, 0, 0], sizes = [1, 8, 1], strides = [1, 1, 1]} : vector<1x8x8xf32> to vector<1x8x1xf32>
    %8 = vector.extract_strided_slice %6 {offsets = [0, 0, 0], sizes = [1, 1, 128], strides = [1, 1, 1]} : vector<1x8x128xf32> to vector<1x1x128xf32>
    %9 = vector.broadcast %7 : vector<1x8x1xf32> to vector<1x8x128xf32>
    %10 = vector.broadcast %8 : vector<1x1x128xf32> to vector<1x8x128xf32>
    %11 = arith.mulf %9, %10 : vector<1x8x128xf32>
    %12 = vector.extract_strided_slice %1 {offsets = [0, 0, 1], sizes = [1, 8, 1], strides = [1, 1, 1]} : vector<1x8x8xf32> to vector<1x8x1xf32>
    %13 = vector.extract_strided_slice %6 {offsets = [0, 1, 0], sizes = [1, 1, 128], strides = [1, 1, 1]} : vector<1x8x128xf32> to vector<1x1x128xf32>
    %14 = vector.broadcast %12 : vector<1x8x1xf32> to vector<1x8x128xf32>
    %15 = vector.broadcast %13 : vector<1x1x128xf32> to vector<1x8x128xf32>
    %16 = arith.mulf %14, %15 : vector<1x8x128xf32>
    %17 = arith.addf %11, %16 : vector<1x8x128xf32>
    %18 = vector.extract_strided_slice %1 {offsets = [0, 0, 2], sizes = [1, 8, 1], strides = [1, 1, 1]} : vector<1x8x8xf32> to vector<1x8x1xf32>
    %19 = vector.extract_strided_slice %6 {offsets = [0, 2, 0], sizes = [1, 1, 128], strides = [1, 1, 1]} : vector<1x8x128xf32> to vector<1x1x128xf32>
    %20 = vector.broadcast %18 : vector<1x8x1xf32> to vector<1x8x128xf32>
    %21 = vector.broadcast %19 : vector<1x1x128xf32> to vector<1x8x128xf32>
    %22 = arith.mulf %20, %21 : vector<1x8x128xf32>
    %23 = arith.addf %17, %22 : vector<1x8x128xf32>
    %24 = vector.extract_strided_slice %1 {offsets = [0, 0, 3], sizes = [1, 8, 1], strides = [1, 1, 1]} : vector<1x8x8xf32> to vector<1x8x1xf32>
    %25 = vector.extract_strided_slice %6 {offsets = [0, 3, 0], sizes = [1, 1, 128], strides = [1, 1, 1]} : vector<1x8x128xf32> to vector<1x1x128xf32>
    %26 = vector.broadcast %24 : vector<1x8x1xf32> to vector<1x8x128xf32>
    %27 = vector.broadcast %25 : vector<1x1x128xf32> to vector<1x8x128xf32>
    %28 = arith.mulf %26, %27 : vector<1x8x128xf32>
    %29 = arith.addf %23, %28 : vector<1x8x128xf32>
    %30 = vector.extract_strided_slice %1 {offsets = [0, 0, 4], sizes = [1, 8, 1], strides = [1, 1, 1]} : vector<1x8x8xf32> to vector<1x8x1xf32>
    %31 = vector.extract_strided_slice %6 {offsets = [0, 4, 0], sizes = [1, 1, 128], strides = [1, 1, 1]} : vector<1x8x128xf32> to vector<1x1x128xf32>
    %32 = vector.broadcast %30 : vector<1x8x1xf32> to vector<1x8x128xf32>
    %33 = vector.broadcast %31 : vector<1x1x128xf32> to vector<1x8x128xf32>
    %34 = arith.mulf %32, %33 : vector<1x8x128xf32>
    %35 = arith.addf %29, %34 : vector<1x8x128xf32>
    %36 = vector.extract_strided_slice %1 {offsets = [0, 0, 5], sizes = [1, 8, 1], strides = [1, 1, 1]} : vector<1x8x8xf32> to vector<1x8x1xf32>
    %37 = vector.extract_strided_slice %6 {offsets = [0, 5, 0], sizes = [1, 1, 128], strides = [1, 1, 1]} : vector<1x8x128xf32> to vector<1x1x128xf32>
    %38 = vector.broadcast %36 : vector<1x8x1xf32> to vector<1x8x128xf32>
    %39 = vector.broadcast %37 : vector<1x1x128xf32> to vector<1x8x128xf32>
    %40 = arith.mulf %38, %39 : vector<1x8x128xf32>
    %41 = arith.addf %35, %40 : vector<1x8x128xf32>
    %42 = vector.extract_strided_slice %1 {offsets = [0, 0, 6], sizes = [1, 8, 1], strides = [1, 1, 1]} : vector<1x8x8xf32> to vector<1x8x1xf32>
    %43 = vector.extract_strided_slice %6 {offsets = [0, 6, 0], sizes = [1, 1, 128], strides = [1, 1, 1]} : vector<1x8x128xf32> to vector<1x1x128xf32>
    %44 = vector.broadcast %42 : vector<1x8x1xf32> to vector<1x8x128xf32>
    %45 = vector.broadcast %43 : vector<1x1x128xf32> to vector<1x8x128xf32>
    %46 = arith.mulf %44, %45 : vector<1x8x128xf32>
    %47 = arith.addf %41, %46 : vector<1x8x128xf32>
    %48 = vector.extract_strided_slice %1 {offsets = [0, 0, 7], sizes = [1, 8, 1], strides = [1, 1, 1]} : vector<1x8x8xf32> to vector<1x8x1xf32>
    %49 = vector.extract_strided_slice %6 {offsets = [0, 7, 0], sizes = [1, 1, 128], strides = [1, 1, 1]} : vector<1x8x128xf32> to vector<1x1x128xf32>
    %50 = vector.broadcast %48 : vector<1x8x1xf32> to vector<1x8x128xf32>
    %51 = vector.broadcast %49 : vector<1x1x128xf32> to vector<1x8x128xf32>
    %52 = arith.mulf %50, %51 : vector<1x8x128xf32>
    %53 = arith.addf %47, %52 : vector<1x8x128xf32>
    %54 = vector.shape_cast %53 : vector<1x8x128xf32> to vector<8x128xf32>
    %55 = vector.broadcast %3 : vector<1x128xf32> to vector<8x128xf32>
    %56 = arith.addf %54, %55 : vector<8x128xf32>
    %c0_8 = arith.constant 0 : index
    %c0_9 = arith.constant 0 : index
    %57 = vector.load %arg5[%c0_8, %c0_9] : memref<8x128xf32, #tpu.memory_space<vmem>>, vector<8x128xf32>
    tpu.vector_store %arg5[%c0_8, %c0_9], %56 {strides = array<i32>} : memref<8x128xf32, #tpu.memory_space<vmem>>, vector<8x128xf32>,
    return
  }
  func.func @transform_0(%arg0: i32) -> (i32, i32) {
    %c0_i32 = arith.constant 0 : i32
    %c0_i32_0 = arith.constant 0 : i32
    return %arg0, %c0_i32 : i32, i32
  }
  func.func @transform_1(%arg0: i32) -> (i32, i32, i32) {
    %c0_i32 = arith.constant 0 : i32
    %c0_i32_0 = arith.constant 0 : i32
    %c0_i32_1 = arith.constant 0 : i32
    return %arg0, %c0_i32, %c0_i32_0 : i32, i32, i32
  }
  func.func @transform_2(%arg0: i32) -> (i32, i32) {
    %c0_i32 = arith.constant 0 : i32
    %c0_i32_0 = arith.constant 0 : i32
    %c0_i32_1 = arith.constant 0 : i32
    return %c0_i32, %c0_i32_0 : i32, i32
  }
  func.func @transform_3(%arg0: i32) -> (i32, i32) {
    %c0_i32 = arith.constant 0 : i32
    %c0_i32_0 = arith.constant 0 : i32
    %c0_i32_1 = arith.constant 0 : i32
    return %c0_i32, %c0_i32_0 : i32, i32
  }
  func.func @transform_4(%arg0: i32) -> (i32, i32) {
    %c0_i32 = arith.constant 0 : i32
    %c0_i32_0 = arith.constant 0 : i32
    return %arg0, %c0_i32 : i32, i32
  }
}

</mosaic_0001>

<bundles_post_ra>
// kernel: tpu_custom_call.1
= control target key start
LH: loop header
LB: loop body
LE: loop exit
PB: predicated region body
PF: predicated region fallthrough
CT: control target
= control target key end

     0   :  { %s959_s0 = inlined_call_operand.hbm [shape: f32[16,16], index: 0, kind: input, shape index: {}]   ;;  %s960_s1 = inlined_call_operand.hbm [shape: f32[2,8,8], index: 1, kind: input, shape index: {}]   ;;  %s961_s2 = inlined_call_operand.hbm [shape: bf16[16,128], index: 2, kind: input, shape index: {}]   ;;  %s962_s3 = inlined_call_operand.vmem [shape: f32[1,128], index: 3, kind: input, shape index: {}]   ;;  %s963_s4 = inlined_call_operand.hbm [shape: f32[16,128], index: 4, kind: output, shape index: {}]  }
   0x1   :  { %965 = sst [smem:[#allocation15_spill]] %s961_s2 }
   0x2   :  { %9 = vsyncpa [#allocation3], 0 }
   0x3   :  { %11 = vsyncpa [#allocation3 + $0x1], 0 }
   0x4   :  { %12 = vsyncpa [#allocation6], 0 }
   0x5   :  { %14 = vsyncpa [#allocation6 + $0x1], 0 }
   0x6   :  { %15 = vsyncpa [#allocation4], 0 }
   0x7   :  { %17 = vsyncpa [#allocation4 + $0x1], 0  ;;  %s786_s15 = smov 0   ;;  %s788_s16 = smov 0  }
   0x8   :  { %s790_s17 = smov 0   ;;  %s792_s18 = smov 0  }
   0x9 LB: > { %966 = sst [smem:[#allocation13_spill]] %s744_s17  ;;  %s810_s22 = sadd.s32 4294967295, %s748_s18   ;;  %s748_s18 = sphi %s792_s18, %s980_s18   ;;  %s744_s17 = sphi %s790_s17, %s977_s17   ;;  %s740_s16 = sphi %s788_s16, %s979_s16   ;;  %s736_s15 = sphi %s786_s15, %s978_s15  }
   0xa   : > { %s967_s2 = sld [smem:[#allocation15_spill]]  ;;  %p480_p0 = scmp.ge.s32.totalorder %s748_s18, 1 }
   0xb   : > { %p44_p1 = scmp.eq.s32.totalorder %s810_s22, 0  ;;  %p148_p2 = scmp.lt.s32.totalorder %s748_s18, 3 }
   0xc   : > { %s750_s24 = smov [#allocation7]   ;;  %s751_s26 = smov 64  }
   0xd   : > { %p815_p3 = pnand %p480_p0, %p148_p2  ;;  %s161_s25 = sshll.u32 %s750_s24, 4  ;;  %s162_s25 = int_to_ptr.vmem [resolvable:$true] %s161_s25 }
   0xe   : > { %s752_s27 = smov 4   ;;  %s479_s28 = sadd.s32 4294967294, %s748_s18  }
   0xf   : > { %p512_p4 = pneg %p815_p3  ;;  %s826_s29 = sadd.s32 1, %s748_s18  }
  0x10   : > { %s159_s21 = sshll.u32 %s967_s2, 4  ;;  %s30_s30 = sadd.s32 1, %s744_s17  ;;  %s160_s21 = int_to_ptr.hbm [resolvable:$true] %s159_s21 }
  0x11   : > { %p513_p6 = pnand %p512_p4, %p44_p1  ;;  %s27_s5 = ssub.s32 %s748_s18, %s826_s29 }
  0x12   : > { %p37_p7 = scmp.ne.s32.totalorder %s744_s17, %s740_s16  ;;  %p28_p8 = scmp.eq.s32.totalorder %s27_s5, 0 }
  0x13   : > { %515 = dma.hbm_to_vmem [thread:$0]  (!%p513_p6), %s160_s21, 128, %s162_s25, [#allocation6], %s751_s26, %s751_s26, %s752_s27  }
  0x14   : > { %p38_p9 = scmp.eq.s32.totalorder %s748_s18, 0  ;;  %p43_p10 = scmp.ne.s32.totalorder %s740_s16, %s736_s15 }
  0x15   : > { %p135_p11 = scmp.eq.s32.totalorder %s810_s22, 1  ;;  %p141_p2 = scmp.eq.s32.totalorder %s479_s28, 1 }
  0x16   : > { %s838_s6 = scalar_select %p28_p8, %s744_s17, %s30_s30  }
  0x17   : > { %p840_p12 = por %p38_p9, %p37_p7  ;;  %p846_p13 = por %p44_p1, %p43_p10 }
  0x18   : > { %969 = sst [smem:[#allocation14_spill]] %s838_s6  ;;  %p850_p0 = por %p135_p11, %p37_p7 }
  0x19   : > { %p528_p4 = scmp.lt.s32.totalorder %s748_s18, 2  ;;  %s178_s10 = sand.u32 1, %s744_s17  }
  0x1a   : > { %p856_p6 = por %p141_p2, %p43_p10  ;;  %s483_s12 = sshll.u32 %s178_s10, 3 }
  0x1b   : > { %s484_s13 = sshll.u32 %s748_s18, 3  ;;  %s182_s24 = scalar_lea.vmem [#allocation2], %s483_s12 }
  0x1c   : > { %s186_s20 = scalar_lea.hbm %s959_s0, %s484_s13  ;;  %s190_s25 = sshll.u32 %s182_s24, 4  ;;  %s191_s25 = int_to_ptr.vmem [resolvable:$true] %s190_s25 }
  0x1d   : > { %s188_s21 = sshll.u32 %s186_s20, 4  ;;  %p866_p7 = pnand %p528_p4, %p840_p12  ;;  %s189_s21 = int_to_ptr.hbm [resolvable:$true] %s188_s21 }
  0x1e   : > { %s205_s30 = scalar_lea.hbm %s960_s1, %s484_s13  ;;  %s197_s5 = sand.u32 1, %s748_s18  }
  0x1f   : > { %s179_s2 = scalar_lea.sflag [#allocation3], %s178_s10  ;;  %s614_s14 = sshra.s32 %s189_s21, 4  ;;  %s615_s14 = int_to_ptr.hbm [resolvable:$true] %s614_s14 }
  0x20   : > { %s616_s19 = scalar_lea.hbm %s615_s14, 8  ;;  %p618_p9 = pneg %p866_p7 }
  0x21   : > { %p617_p8 = scmp.ne.s32.totalorder %s615_s14, %s616_s19  ;;  %s621_s24 = scalar_lea.hbm %s959_s0, 16 }
  0x22   : > { %p622_p12 = scmp.lt.s32.totalorder %s615_s14, %s959_s0  ;;  %p623_p2 = scmp.lt.s32.totalorder %s621_s24, %s616_s19 }
  0x23   : > { %p619_p10 = pnand %p618_p9, %p617_p8 }
  0x24   : > { %p624_p4 = por %p623_p2, %p622_p12 }
  0x25   : > { %p620_p11 = pneg %p619_p10 }
  0x27   : > { %p625_p5 = pnand %p624_p4, %p620_p11 }
  0x29   : > { %628 = shalt.err (!%p625_p5)
}
  0x2a   : > { %519 = dma.hbm_to_vmem [thread:$0]  (!%p866_p7), %s189_s21, 128, %s191_s25, %s179_s2  }
  0x2b   : > { %s207_s10 = sshll.u32 %s205_s30, 4  ;;  %s201_s13 = scalar_lea.vmem [#allocation5], %s483_s12  ;;  %s208_s10 = int_to_ptr.hbm [resolvable:$true] %s207_s10 }
  0x2c   : > { %s209_s6 = sshll.u32 %s201_s13, 4  ;;  %s198_s17 = scalar_lea.sflag [#allocation6], %s197_s5  ;;  %s210_s6 = int_to_ptr.vmem [resolvable:$true] %s209_s6 }
  0x2d   : > { %s644_s7 = sshra.s32 %s208_s10, 4  ;;  %s651_s24 = scalar_lea.hbm %s960_s1, 16  ;;  %s645_s7 = int_to_ptr.hbm [resolvable:$true] %s644_s7 }
  0x2e   : > { %s646_s20 = scalar_lea.hbm %s645_s7, 8  ;;  %p652_p5 = scmp.lt.s32.totalorder %s645_s7, %s960_s1 }
  0x2f   : > { %p647_p8 = scmp.ne.s32.totalorder %s645_s7, %s646_s20  ;;  %p653_p11 = scmp.lt.s32.totalorder %s651_s24, %s646_s20 }
  0x31   : > { %p649_p10 = pnand %p647_p8, %p618_p9  ;;  %p654_p2 = por %p653_p11, %p652_p5 }
  0x33   : > { %p650_p12 = pneg %p649_p10 }
  0x35   : > { %p655_p4 = pnand %p654_p2, %p650_p12 }
  0x37   : > { %658 = shalt.err (!%p655_p4)
}
  0x38   : > { %522 = dma.hbm_to_vmem [thread:$0]  (!%p866_p7), %s208_s10, 128, %s210_s6, %s198_s17  }
  0x39   : > { %218 = sbr.rel (%p815_p3) target bundleno = 223 (0xdf), region = 36  ;;  %s901_s12 = sand.u32 (!%p815_p3), 1, %s740_s16  }
  0x3a   : > { %s904_s21 = sshll.u32 (!%p815_p3), %s901_s12, 3  ;;  %s221_s25 = scalar_lea.sflag (!%p815_p3), [#allocation3], %s901_s12 }
  0x3b   : > { %s224_s30 = scalar_lea.vmem (!%p815_p3), [#allocation2], %s904_s21 }
  0x3e   : > { %719 = dma.done.wait (%p846_p13), %s221_s25, 128  }
  0x3f   : > { %721 = vsyncadd (%p846_p13), %s221_s25, 4294967168  ;;  %s230_s17 = sand.u32 1, %s810_s22   ;;  %s234_s6 = scalar_lea.vmem [#allocation5], %s904_s21 }
  0x40   : > { %s231_s23 = scalar_lea.sflag [#allocation6], %s230_s17 }
  0x41   : > { %723 = dma.done.wait (%p846_p13), %s231_s23, 128  }
  0x42   : > { %725 = vsyncadd (%p846_p13), %s231_s23, 4294967168 }
  0x43   : > { %727 = dma.done.wait (%p44_p1), [#allocation6], 128  }
  0x44   : > { %729 = vsyncadd (%p44_p1), [#allocation6], 4294967168  ;;  %v753_v0 = vmov 2   ;;  %v754_v1 = vmov 0   ;;  %v755_v2 = vmov 4   ;;  %v272_v3 = vld [vmem:[%s234_s6] sm:$0xff] }
  0x45   : > { %576 = vset.pattern.permute.xlu1 %v753_v0  ;;  %574 = vset.pattern.permute.xlu0 %v754_v1  ;;  %v501_v4 = vld [vmem:[#allocation7] sm:$0xff]  ;;  %vm283_vm0 = vcmask 130048   ;;  %v756_v7 = vmov 3   ;;  %v757_v8 = vmov 1   ;;  %v758_v9 = vmov 5   ;;  %s498_s8 = sshll.u32 %s810_s22, 3 }
  0x46   : > { %578 = vset.pattern.permute.xlu2 %v755_v2  ;;  %v271_v5 = vld [vmem:[%s224_s30] sm:$0xff]  ;;  %315 = vperm.xlu1 %576, %v272_v3   ;;  %v759_v10 = vmov 6   ;;  %v760_v11 = vmov 7   ;;  %s372_s28 = scalar_lea.hbm %s963_s4, %s498_s8  ;;  %s269_s7 = scalar_lea.vmem [#allocation8], %s904_s21 }
  0x47   : > { %v276_v6 = vpack.c.bf16 %v271_v5, %v271_v5  ;;  %302 = vperm.xlu0 %574, %v272_v3   ;;  %294 = vmatpush.bf16.msra.mxu0 %v501_v4  ;;  %v583_v44 = vld [vmem:[%s962_s3] ss:$0 sm:$0xff]  ;;  %s374_s22 = sshll.u32 %s269_s7, 4  ;;  %s376_s20 = sshll.u32 %s372_s28, 4  ;;  %s375_s22 = int_to_ptr.vmem [resolvable:$true] %s374_s22  ;;  %s377_s20 = int_to_ptr.hbm [resolvable:$true] %s376_s20 }
  0x48   : > { %329 = vperm.xlu2 %578, %v272_v3   ;;  %s362_s14 = scalar_lea.sflag [#allocation4], %s901_s12  ;;  %s688_s19 = sshra.s32 %s377_s20, 4  ;;  %s689_s19 = int_to_ptr.hbm [resolvable:$true] %s688_s19 }
  0x49   : > { %s690_s24 = scalar_lea.hbm %s689_s19, 8  ;;  %s694_s25 = scalar_lea.hbm %s963_s4, 16 }
  0x4a   : > { %496 = vmatmul.msk.bf16.vlgmr.msra.gmra.mxu0 %vm283_vm0, %v276_v6  ;;  %p691_p1 = scmp.ne.s32.totalorder %s689_s19, %s690_s24  ;;  %p695_p7 = scmp.lt.s32.totalorder %s689_s19, %s963_s4 }
  0x4b   : > { %p696_p9 = scmp.lt.s32.totalorder %s694_s25, %s690_s24 }
  0x4c   : > { %p692_p3 = pnand %p691_p1, %p850_p0 }
  0x4d   : > { %p697_p8 = por %p696_p9, %p695_p7 }
  0x4e   : > { %577 = vset.pattern.permute.xlu1 %v756_v7  ;;  %p693_p13 = pneg %p692_p3 }
  0x4f   : > { %575 = vset.pattern.permute.xlu0 %v757_v8  ;;  %322 = vperm.xlu1 %577, %v272_v3  }
  0x50   : > { %308 = vperm.xlu0 %575, %v272_v3   ;;  %579 = vset.pattern.permute.xlu2 %v758_v9  ;;  %p698_p10 = pnand %p697_p8, %p693_p13 }
  0x51   : > { %336 = vperm.xlu2 %579, %v272_v3  }
  0x57   : > { %580 = vset.pattern.permute.xlu1 %v759_v10 }
  0x58   : > { %582 = vset.pattern.permute.xlu0 %v760_v11  ;;  %343 = vperm.xlu1 %580, %v272_v3  }
  0x59   : > { %581 = vset.pattern.permute.xlu2 %v760_v11 }
  0x5a   : > { %350 = vperm.xlu2 %581, %v272_v3  }
  0xa2   : > { %v330_v14 = vpop.permute.xlu2 %329 }
  0xab   : > { %v337_v20 = vpop.permute.xlu2 %336 }
  0xb4   : > { %v351_v39 = vpop.permute.xlu2 %350 }
  0xb8   : > { %v316_v12 = vpop.permute.xlu1 %315 }
  0xb9   : > { %v303_v13 = vpop.permute.xlu0 %302 }
  0xc1   : > { %v323_v15 = vpop.permute.xlu1 %322 }
  0xc2   : > { %v309_v17 = vpop.permute.xlu0 %308 }
  0xc7   : > { %v296_v16 = vpop.f32.mrf.mxu0 }
  0xc8   : > { %v305_v18 = vperm.slane %v296_v16, 0  ;;  %v311_v19 = vperm.slane %v296_v16, 1  ;;  %v318_v21 = vperm.slane %v296_v16, 2  ;;  %v325_v24 = vperm.slane %v296_v16, 3 }
  0xc9   : > { %v332_v27 = vperm.slane %v296_v16, 4  ;;  %v339_v30 = vperm.slane %v296_v16, 5  ;;  %v346_v32 = vperm.slane %v296_v16, 6  ;;  %v353_v36 = vperm.slane %v296_v16, 7 }
  0xca   : > { %v306_v22 = vmul.f32 %v305_v18, %v303_v13  ;;  %v312_v23 = vmul.f32 %v311_v19, %v309_v17  ;;  %v319_v26 = vmul.f32 %v318_v21, %v316_v12  ;;  %v326_v29 = vmul.f32 %v325_v24, %v323_v15  ;;  %v344_v35 = vpop.permute.xlu1 %343 }
  0xcb   : > { %v333_v34 = vmul.f32 %v332_v27, %v330_v14  ;;  %v340_v38 = vmul.f32 %v339_v30, %v337_v20  ;;  %v347_v40 = vmul.f32 %v346_v32, %v344_v35  ;;  %v354_v42 = vmul.f32 %v353_v36, %v351_v39 }
  0xcc   : > { %v313_v25 = vadd.f32 %v312_v23, %v306_v22 }
  0xce   : > { %v320_v28 = vadd.f32 %v319_v26, %v313_v25 }
  0xcf   : > { %v298_v31 = vpop.f32.mrf.mxu0 }
  0xd0   : > { %v327_v33 = vadd.f32 %v326_v29, %v320_v28 }
  0xd2   : > { %v334_v37 = vadd.f32 %v333_v34, %v327_v33 }
  0xd4   : > { %v341_v41 = vadd.f32 %v340_v38, %v334_v37 }
  0xd6   : > { %v348_v43 = vadd.f32 %v347_v40, %v341_v41 }
  0xd8   : > { %v355_v45 = vadd.f32 %v354_v42, %v348_v43 }
  0xda   : > { %v359_v46 = vadd.f32 %v583_v44, %v355_v45 }
  0xdc   : > { %360 = vst [vmem:[%s269_s7] sm:$0xff] %v359_v46 }
  0xdd   : > { %701 = shalt.err (!%p698_p10)
}
  0xde   : > { %510 = dma.vmem_to_hbm [thread:$0]  (%p850_p0), %s375_s22, 128, %s377_s20, %s362_s14  }
  0xdf PF: > { %s388_s12 = sand.u32 1, %s736_s15   ;;  %p975_p12 = scmp.ge.s32.totalorder %s748_s18, 2 }
  0xe0   : > { %s389_s17 = scalar_lea.sflag [#allocation4], %s388_s12 }
  0xe1   : > { %p524_p5 = pnand %p975_p12, %p856_p6 }
  0xe3   : > { %p525_p11 = pneg %p524_p5 }
  0xe5   : > { %731 = dma.done.wait (%p525_p11), %s389_s17, 128  }
  0xe6   : > { %733 = vsyncadd (%p525_p11), %s389_s17, 4294967168  ;;  %s976_s23 = sld [smem:[#allocation13_spill]]  ;;  %p20_p2 = scmp.ge.s32.totalorder %s826_s29, 4  }
  0xe7   : > { %s977_s17 = sld [smem:[#allocation14_spill]]  ;;  %s978_s15 = smov %s740_s16 }
  0xe8   : > { %s980_s18 = smov %s826_s29  ;;  %22 = sbr.rel (!%p20_p2) target bundleno = 9 (0x9), region = 98 }
  0xec   : > { %s979_s16 = smov %s976_s23 }
  0xed   :  { %395 = vsyncpa [#allocation3], 1 }
  0xee   :  { %397 = vsyncpa [#allocation3 + $0x1], 1 }
  0xef   :  { %398 = vsyncpa [#allocation6], 1 }
  0xf0   :  { %400 = vsyncpa [#allocation6 + $0x1], 1 }
  0xf1   :  { %401 = vsyncpa [#allocation4], 1 }
  0xf2   :  { %403 = vsyncpa [#allocation4 + $0x1], 1 }

// kernel: tpu_custom_call.1
= control target key start
LH: loop header
LB: loop body
LE: loop exit
PB: predicated region body
PF: predicated region fallthrough
CT: control target
= control target key end

     0   :  { %s959_s0 = inlined_call_operand.hbm [shape: f32[16,16], index: 0, kind: input, shape index: {}]   ;;  %s960_s1 = inlined_call_operand.hbm [shape: f32[2,8,8], index: 1, kind: input, shape index: {}]   ;;  %s961_s2 = inlined_call_operand.hbm [shape: bf16[16,128], index: 2, kind: input, shape index: {}]   ;;  %s962_s3 = inlined_call_operand.vmem [shape: f32[1,128], index: 3, kind: input, shape index: {}]   ;;  %s963_s4 = inlined_call_operand.hbm [shape: f32[16,128], index: 4, kind: output, shape index: {}]  }
   0x1   :  { %965 = sst [smem:[#allocation15_spill]] %s961_s2 }
   0x2   :  { %9 = vsyncpa [#allocation3], 0 }
   0x3   :  { %11 = vsyncpa [#allocation3 + $0x1], 0 }
   0x4   :  { %12 = vsyncpa [#allocation6], 0 }
   0x5   :  { %14 = vsyncpa [#allocation6 + $0x1], 0 }
   0x6   :  { %15 = vsyncpa [#allocation4], 0 }
   0x7   :  { %17 = vsyncpa [#allocation4 + $0x1], 0  ;;  %s786_s15 = smov 0   ;;  %s788_s16 = smov 0  }
   0x8   :  { %s790_s17 = smov 0   ;;  %s792_s18 = smov 0  }
   0x9 LB: > { %966 = sst [smem:[#allocation13_spill]] %s744_s17  ;;  %s810_s22 = sadd.s32 4294967295, %s748_s18   ;;  %s748_s18 = sphi %s792_s18, %s980_s18   ;;  %s744_s17 = sphi %s790_s17, %s977_s17   ;;  %s740_s16 = sphi %s788_s16, %s979_s16   ;;  %s736_s15 = sphi %s786_s15, %s978_s15  }
   0xa   : > { %s967_s2 = sld [smem:[#allocation15_spill]]  ;;  %p480_p0 = scmp.ge.s32.totalorder %s748_s18, 1 }
   0xb   : > { %p44_p1 = scmp.eq.s32.totalorder %s810_s22, 0  ;;  %p148_p2 = scmp.lt.s32.totalorder %s748_s18, 3 }
   0xc   : > { %s750_s24 = smov [#allocation7]   ;;  %s751_s26 = smov 64  }
   0xd   : > { %p815_p3 = pnand %p480_p0, %p148_p2  ;;  %s161_s25 = sshll.u32 %s750_s24, 4  ;;  %s162_s25 = int_to_ptr.vmem [resolvable:$true] %s161_s25 }
   0xe   : > { %s752_s27 = smov 4   ;;  %s479_s28 = sadd.s32 4294967294, %s748_s18  }
   0xf   : > { %p512_p4 = pneg %p815_p3  ;;  %s826_s29 = sadd.s32 1, %s748_s18  }
  0x10   : > { %s159_s21 = sshll.u32 %s967_s2, 4  ;;  %s30_s30 = sadd.s32 1, %s744_s17  ;;  %s160_s21 = int_to_ptr.hbm [resolvable:$true] %s159_s21 }
  0x11   : > { %p513_p6 = pnand %p512_p4, %p44_p1  ;;  %s27_s5 = ssub.s32 %s748_s18, %s826_s29 }
  0x12   : > { %p37_p7 = scmp.ne.s32.totalorder %s744_s17, %s740_s16  ;;  %p28_p8 = scmp.eq.s32.totalorder %s27_s5, 0 }
  0x13   : > { %515 = dma.hbm_to_vmem [thread:$0]  (!%p513_p6), %s160_s21, 128, %s162_s25, [#allocation6], %s751_s26, %s751_s26, %s752_s27  }
  0x14   : > { %p38_p9 = scmp.eq.s32.totalorder %s748_s18, 0  ;;  %p43_p10 = scmp.ne.s32.totalorder %s740_s16, %s736_s15 }
  0x15   : > { %p135_p11 = scmp.eq.s32.totalorder %s810_s22, 1  ;;  %p141_p2 = scmp.eq.s32.totalorder %s479_s28, 1 }
  0x16   : > { %s838_s6 = scalar_select %p28_p8, %s744_s17, %s30_s30  }
  0x17   : > { %p840_p12 = por %p38_p9, %p37_p7  ;;  %p846_p13 = por %p44_p1, %p43_p10 }
  0x18   : > { %969 = sst [smem:[#allocation14_spill]] %s838_s6  ;;  %p850_p0 = por %p135_p11, %p37_p7 }
  0x19   : > { %p528_p4 = scmp.lt.s32.totalorder %s748_s18, 2  ;;  %s178_s10 = sand.u32 1, %s744_s17  }
  0x1a   : > { %p856_p6 = por %p141_p2, %p43_p10  ;;  %s483_s12 = sshll.u32 %s178_s10, 3 }
  0x1b   : > { %s484_s13 = sshll.u32 %s748_s18, 3  ;;  %s182_s24 = scalar_lea.vmem [#allocation2], %s483_s12 }
  0x1c   : > { %s186_s20 = scalar_lea.hbm %s959_s0, %s484_s13  ;;  %s190_s25 = sshll.u32 %s182_s24, 4  ;;  %s191_s25 = int_to_ptr.vmem [resolvable:$true] %s190_s25 }
  0x1d   : > { %s188_s21 = sshll.u32 %s186_s20, 4  ;;  %p866_p7 = pnand %p528_p4, %p840_p12  ;;  %s189_s21 = int_to_ptr.hbm [resolvable:$true] %s188_s21 }
  0x1e   : > { %s205_s30 = scalar_lea.hbm %s960_s1, %s484_s13  ;;  %s197_s5 = sand.u32 1, %s748_s18  }
  0x1f   : > { %s179_s2 = scalar_lea.sflag [#allocation3], %s178_s10  ;;  %s614_s14 = sshra.s32 %s189_s21, 4  ;;  %s615_s14 = int_to_ptr.hbm [resolvable:$true] %s614_s14 }
  0x20   : > { %s616_s19 = scalar_lea.hbm %s615_s14, 8  ;;  %p618_p9 = pneg %p866_p7 }
  0x21   : > { %p617_p8 = scmp.ne.s32.totalorder %s615_s14, %s616_s19  ;;  %s621_s24 = scalar_lea.hbm %s959_s0, 16 }
  0x22   : > { %p622_p12 = scmp.lt.s32.totalorder %s615_s14, %s959_s0  ;;  %p623_p2 = scmp.lt.s32.totalorder %s621_s24, %s616_s19 }
  0x23   : > { %p619_p10 = pnand %p618_p9, %p617_p8 }
  0x24   : > { %p624_p4 = por %p623_p2, %p622_p12 }
  0x25   : > { %p620_p11 = pneg %p619_p10 }
  0x27   : > { %p625_p5 = pnand %p624_p4, %p620_p11 }
  0x29   : > { %628 = shalt.err (!%p625_p5)
}
  0x2a   : > { %519 = dma.hbm_to_vmem [thread:$0]  (!%p866_p7), %s189_s21, 128, %s191_s25, %s179_s2  }
  0x2b   : > { %s207_s10 = sshll.u32 %s205_s30, 4  ;;  %s201_s13 = scalar_lea.vmem [#allocation5], %s483_s12  ;;  %s208_s10 = int_to_ptr.hbm [resolvable:$true] %s207_s10 }
  0x2c   : > { %s209_s6 = sshll.u32 %s201_s13, 4  ;;  %s198_s17 = scalar_lea.sflag [#allocation6], %s197_s5  ;;  %s210_s6 = int_to_ptr.vmem [resolvable:$true] %s209_s6 }
  0x2d   : > { %s644_s7 = sshra.s32 %s208_s10, 4  ;;  %s651_s24 = scalar_lea.hbm %s960_s1, 16  ;;  %s645_s7 = int_to_ptr.hbm [resolvable:$true] %s644_s7 }
  0x2e   : > { %s646_s20 = scalar_lea.hbm %s645_s7, 8  ;;  %p652_p5 = scmp.lt.s32.totalorder %s645_s7, %s960_s1 }
  0x2f   : > { %p647_p8 = scmp.ne.s32.totalorder %s645_s7, %s646_s20  ;;  %p653_p11 = scmp.lt.s32.totalorder %s651_s24, %s646_s20 }
  0x31   : > { %p649_p10 = pnand %p647_p8, %p618_p9  ;;  %p654_p2 = por %p653_p11, %p652_p5 }
  0x33   : > { %p650_p12 = pneg %p649_p10 }
  0x35   : > { %p655_p4 = pnand %p654_p2, %p650_p12 }
  0x37   : > { %658 = shalt.err (!%p655_p4)
}
  0x38   : > { %522 = dma.hbm_to_vmem [thread:$0]  (!%p866_p7), %s208_s10, 128, %s210_s6, %s198_s17  }
  0x39   : > { %218 = sbr.rel (%p815_p3) target bundleno = 223 (0xdf), region = 36  ;;  %s901_s12 = sand.u32 (!%p815_p3), 1, %s740_s16  }
  0x3a   : > { %s904_s21 = sshll.u32 (!%p815_p3), %s901_s12, 3  ;;  %s221_s25 = scalar_lea.sflag (!%p815_p3), [#allocation3], %s901_s12 }
  0x3b   : > { %s224_s30 = scalar_lea.vmem (!%p815_p3), [#allocation2], %s904_s21 }
  0x3e   : > { %719 = dma.done.wait (%p846_p13), %s221_s25, 128  }
  0x3f   : > { %721 = vsyncadd (%p846_p13), %s221_s25, 4294967168  ;;  %s230_s17 = sand.u32 1, %s810_s22   ;;  %s234_s6 = scalar_lea.vmem [#allocation5], %s904_s21 }
  0x40   : > { %s231_s23 = scalar_lea.sflag [#allocation6], %s230_s17 }
  0x41   : > { %723 = dma.done.wait (%p846_p13), %s231_s23, 128  }
  0x42   : > { %725 = vsyncadd (%p846_p13), %s231_s23, 4294967168 }
  0x43   : > { %727 = dma.done.wait (%p44_p1), [#allocation6], 128  }
  0x44   : > { %729 = vsyncadd (%p44_p1), [#allocation6], 4294967168  ;;  %v753_v0 = vmov 2   ;;  %v754_v1 = vmov 0   ;;  %v755_v2 = vmov 4   ;;  %v272_v3 = vld [vmem:[%s234_s6] sm:$0xff] }
  0x45   : > { %576 = vset.pattern.permute.xlu1 %v753_v0  ;;  %574 = vset.pattern.permute.xlu0 %v754_v1  ;;  %v501_v4 = vld [vmem:[#allocation7] sm:$0xff]  ;;  %vm283_vm0 = vcmask 130048   ;;  %v756_v7 = vmov 3   ;;  %v757_v8 = vmov 1   ;;  %v758_v9 = vmov 5   ;;  %s498_s8 = sshll.u32 %s810_s22, 3 }
  0x46   : > { %578 = vset.pattern.permute.xlu2 %v755_v2  ;;  %v271_v5 = vld [vmem:[%s224_s30] sm:$0xff]  ;;  %315 = vperm.xlu1 %576, %v272_v3   ;;  %v759_v10 = vmov 6   ;;  %v760_v11 = vmov 7   ;;  %s372_s28 = scalar_lea.hbm %s963_s4, %s498_s8  ;;  %s269_s7 = scalar_lea.vmem [#allocation8], %s904_s21 }
  0x47   : > { %v276_v6 = vpack.c.bf16 %v271_v5, %v271_v5  ;;  %302 = vperm.xlu0 %574, %v272_v3   ;;  %294 = vmatpush.bf16.msra.mxu0 %v501_v4  ;;  %v583_v44 = vld [vmem:[%s962_s3] ss:$0 sm:$0xff]  ;;  %s374_s22 = sshll.u32 %s269_s7, 4  ;;  %s376_s20 = sshll.u32 %s372_s28, 4  ;;  %s375_s22 = int_to_ptr.vmem [resolvable:$true] %s374_s22  ;;  %s377_s20 = int_to_ptr.hbm [resolvable:$true] %s376_s20 }
  0x48   : > { %329 = vperm.xlu2 %578, %v272_v3   ;;  %s362_s14 = scalar_lea.sflag [#allocation4], %s901_s12  ;;  %s688_s19 = sshra.s32 %s377_s20, 4  ;;  %s689_s19 = int_to_ptr.hbm [resolvable:$true] %s688_s19 }
  0x49   : > { %s690_s24 = scalar_lea.hbm %s689_s19, 8  ;;  %s694_s25 = scalar_lea.hbm %s963_s4, 16 }
  0x4a   : > { %496 = vmatmul.msk.bf16.vlgmr.msra.gmra.mxu0 %vm283_vm0, %v276_v6  ;;  %p691_p1 = scmp.ne.s32.totalorder %s689_s19, %s690_s24  ;;  %p695_p7 = scmp.lt.s32.totalorder %s689_s19, %s963_s4 }
  0x4b   : > { %p696_p9 = scmp.lt.s32.totalorder %s694_s25, %s690_s24 }
  0x4c   : > { %p692_p3 = pnand %p691_p1, %p850_p0 }
  0x4d   : > { %p697_p8 = por %p696_p9, %p695_p7 }
  0x4e   : > { %577 = vset.pattern.permute.xlu1 %v756_v7  ;;  %p693_p13 = pneg %p692_p3 }
  0x4f   : > { %575 = vset.pattern.permute.xlu0 %v757_v8  ;;  %322 = vperm.xlu1 %577, %v272_v3  }
  0x50   : > { %308 = vperm.xlu0 %575, %v272_v3   ;;  %579 = vset.pattern.permute.xlu2 %v758_v9  ;;  %p698_p10 = pnand %p697_p8, %p693_p13 }
  0x51   : > { %336 = vperm.xlu2 %579, %v272_v3  }
  0x57   : > { %580 = vset.pattern.permute.xlu1 %v759_v10 }
  0x58   : > { %582 = vset.pattern.permute.xlu0 %v760_v11  ;;  %343 = vperm.xlu1 %580, %v272_v3  }
  0x59   : > { %581 = vset.pattern.permute.xlu2 %v760_v11 }
  0x5a   : > { %350 = vperm.xlu2 %581, %v272_v3  }
  0xa2   : > { %v330_v14 = vpop.permute.xlu2 %329 }
  0xab   : > { %v337_v20 = vpop.permute.xlu2 %336 }
  0xb4   : > { %v351_v39 = vpop.permute.xlu2 %350 }
  0xb8   : > { %v316_v12 = vpop.permute.xlu1 %315 }
  0xb9   : > { %v303_v13 = vpop.permute.xlu0 %302 }
  0xc1   : > { %v323_v15 = vpop.permute.xlu1 %322 }
  0xc2   : > { %v309_v17 = vpop.permute.xlu0 %308 }
  0xc7   : > { %v296_v16 = vpop.f32.mrf.mxu0 }
  0xc8   : > { %v305_v18 = vperm.slane %v296_v16, 0  ;;  %v311_v19 = vperm.slane %v296_v16, 1  ;;  %v318_v21 = vperm.slane %v296_v16, 2  ;;  %v325_v24 = vperm.slane %v296_v16, 3 }
  0xc9   : > { %v332_v27 = vperm.slane %v296_v16, 4  ;;  %v339_v30 = vperm.slane %v296_v16, 5  ;;  %v346_v32 = vperm.slane %v296_v16, 6  ;;  %v353_v36 = vperm.slane %v296_v16, 7 }
  0xca   : > { %v306_v22 = vmul.f32 %v305_v18, %v303_v13  ;;  %v312_v23 = vmul.f32 %v311_v19, %v309_v17  ;;  %v319_v26 = vmul.f32 %v318_v21, %v316_v12  ;;  %v326_v29 = vmul.f32 %v325_v24, %v323_v15  ;;  %v344_v35 = vpop.permute.xlu1 %343 }
  0xcb   : > { %v333_v34 = vmul.f32 %v332_v27, %v330_v14  ;;  %v340_v38 = vmul.f32 %v339_v30, %v337_v20  ;;  %v347_v40 = vmul.f32 %v346_v32, %v344_v35  ;;  %v354_v42 = vmul.f32 %v353_v36, %v351_v39 }
  0xcc   : > { %v313_v25 = vadd.f32 %v312_v23, %v306_v22 }
  0xce   : > { %v320_v28 = vadd.f32 %v319_v26, %v313_v25 }
  0xcf   : > { %v298_v31 = vpop.f32.mrf.mxu0 }
  0xd0   : > { %v327_v33 = vadd.f32 %v326_v29, %v320_v28 }
  0xd2   : > { %v334_v37 = vadd.f32 %v333_v34, %v327_v33 }
  0xd4   : > { %v341_v41 = vadd.f32 %v340_v38, %v334_v37 }
  0xd6   : > { %v348_v43 = vadd.f32 %v347_v40, %v341_v41 }
  0xd8   : > { %v355_v45 = vadd.f32 %v354_v42, %v348_v43 }
  0xda   : > { %v359_v46 = vadd.f32 %v583_v44, %v355_v45 }
  0xdc   : > { %360 = vst [vmem:[%s269_s7] sm:$0xff] %v359_v46 }
  0xdd   : > { %701 = shalt.err (!%p698_p10)
}
  0xde   : > { %510 = dma.vmem_to_hbm [thread:$0]  (%p850_p0), %s375_s22, 128, %s377_s20, %s362_s14  }
  0xdf PF: > { %s388_s12 = sand.u32 1, %s736_s15   ;;  %p975_p12 = scmp.ge.s32.totalorder %s748_s18, 2 }
  0xe0   : > { %s389_s17 = scalar_lea.sflag [#allocation4], %s388_s12 }
  0xe1   : > { %p524_p5 = pnand %p975_p12, %p856_p6 }
  0xe3   : > { %p525_p11 = pneg %p524_p5 }
  0xe5   : > { %731 = dma.done.wait (%p525_p11), %s389_s17, 128  }
  0xe6   : > { %733 = vsyncadd (%p525_p11), %s389_s17, 4294967168  ;;  %s976_s23 = sld [smem:[#allocation13_spill]]  ;;  %p20_p2 = scmp.ge.s32.totalorder %s826_s29, 4  }
  0xe7   : > { %s977_s17 = sld [smem:[#allocation14_spill]]  ;;  %s978_s15 = smov %s740_s16 }
  0xe8   : > { %s980_s18 = smov %s826_s29  ;;  %22 = sbr.rel (!%p20_p2) target bundleno = 9 (0x9), region = 98 }
  0xec   : > { %s979_s16 = smov %s976_s23 }
  0xed   :  { %395 = vsyncpa [#allocation3], 1 }
  0xee   :  { %397 = vsyncpa [#allocation3 + $0x1], 1 }
  0xef   :  { %398 = vsyncpa [#allocation6], 1 }
  0xf0   :  { %400 = vsyncpa [#allocation6 + $0x1], 1 }
  0xf1   :  { %401 = vsyncpa [#allocation4], 1 }
  0xf2   :  { %403 = vsyncpa [#allocation4 + $0x1], 1 }

</bundles_post_ra>
